<compile_context>
chip_gen: v7x
topology: tpu7x:2x2x1
jax: 0.10.0
libtpu: 0.0.40
codegen_flags: <defaults>
</compile_context>

<pallas_src>
import math
import functools
import numpy as np

import jax
import jax.numpy as jnp
from jax.experimental import pallas as pl
from jax.experimental.pallas import tpu as pltpu

F32 = jnp.float32
BF16 = jnp.bfloat16


# ----------------------------------------------------------------------------
# DCT kernel initialization (verbatim port of initDCTKernel)
# ----------------------------------------------------------------------------
def initDCTKernel(N):
    kernel = np.zeros((N, N, N * N))
    cnum = 0
    for i in range(N):
        for j in range(N):
            ivec = np.linspace(0.5 * math.pi / N * i, (N - 0.5) * math.pi / N * i, num=N)
            ivec = np.cos(ivec)
            jvec = np.linspace(0.5 * math.pi / N * j, (N - 0.5) * math.pi / N * j, num=N)
            jvec = np.cos(jvec)
            slc = np.outer(ivec, jvec)
            if i == 0 and j == 0:
                slc = slc / N
            elif i * j == 0:
                slc = slc * np.sqrt(2) / N
            else:
                slc = slc * 2.0 / N
            kernel[:, :, cnum] = slc
            cnum += 1
    kernel = kernel[np.newaxis, :]
    kernel = np.transpose(kernel, (3, 0, 1, 2))  # (N*N, 1, N, N)  PyTorch OIHW
    return kernel


# ----------------------------------------------------------------------------
# Tiny conditioning kernels (whole chain fused into one pallas_call each)
# ----------------------------------------------------------------------------
def _zmlp_kernel(*refs):
    # refs = (z, w0, b0, w1, b1, ..., out): PixelNorm -> [dense -> SiLU] chain
    z_ref, o_ref, wb = refs[0], refs[-1], refs[1:-1]
    z = z_ref[...]
    ms = jnp.mean(z * z, axis=1, keepdims=True)
    h = z * jax.lax.rsqrt(ms + 1e-8)                   # PixelNorm
    for i in range(0, len(wb), 2):
        h = jnp.dot(h, wb[i][...], preferred_element_type=jnp.float32) + wb[i + 1][...]
        h = h * jax.nn.sigmoid(h)                      # SiLU
    o_ref[...] = h


def z_transform_pallas(z, ws, bs):
    vspec = pl.BlockSpec(memory_space=pltpu.MemorySpace.VMEM)
    args = [z.astype(F32)]
    for w, b in zip(ws, bs):
        args.append(w.astype(F32))
        args.append(b.reshape(1, -1).astype(F32))
    return pl.pallas_call(
        _zmlp_kernel,
        out_shape=jax.ShapeDtypeStruct((z.shape[0], ws[-1].shape[1]), F32),
        in_specs=[vspec] * len(args),
        out_specs=vspec,
    )(*args)


def _temb_mlp_kernel(t_ref, w0_ref, b0_ref, w1_ref, b1_ref, o_ref):
    h = jnp.dot(t_ref[...], w0_ref[...], preferred_element_type=jnp.float32) + b0_ref[...]
    h = h * jax.nn.sigmoid(h)
    o_ref[...] = jnp.dot(h, w1_ref[...], preferred_element_type=jnp.float32) + b1_ref[...]


def temb_mlp_pallas(temb, w0, b0, w1, b1):
    vspec = pl.BlockSpec(memory_space=pltpu.MemorySpace.VMEM)
    return pl.pallas_call(
        _temb_mlp_kernel,
        out_shape=jax.ShapeDtypeStruct((temb.shape[0], w1.shape[1]), F32),
        in_specs=[vspec] * 5,
        out_specs=vspec,
    )(temb.astype(F32), w0.astype(F32), b0.reshape(1, -1).astype(F32),
      w1.astype(F32), b1.reshape(1, -1).astype(F32))


def get_timestep_embedding(timesteps, embedding_dim, max_positions=10000):
    half_dim = embedding_dim // 2
    emb = math.log(max_positions) / (half_dim - 1)
    emb = jnp.exp(jnp.arange(half_dim, dtype=F32) * -emb)
    emb = timesteps.astype(F32)[:, None] * emb[None, :]
    emb = jnp.concatenate([jnp.sin(emb), jnp.cos(emb)], axis=1)
    if embedding_dim % 2 == 1:
        emb = jnp.pad(emb, ((0, 0), (0, 1)))
    return emb


# ----------------------------------------------------------------------------
# Fused "front" kernel: 9 DCT convs + 3 AdaptiveCombiners + x-feature conv
# writing one lane-dense (M, nf + 3*64) hs[0] slab.
# ----------------------------------------------------------------------------
def _front_kernel(xp_ref,
                  p3a_ref, p3b_ref, p3c_ref,
                  p5a_ref, p5b_ref, p5c_ref,
                  p7a_ref, p7b_ref, p7c_ref,
                  wx_ref, bx_ref,
                  c3_w1a, c3_w1b, c3_w1c, c3_b1, c3_w2, c3_b2, c3_wf,
                  c5_w1a, c5_w1b, c5_w1c, c5_b1, c5_w2, c5_b2, c5_wf,
                  c7_w1a, c7_w1b, c7_w1c, c7_b1, c7_w2, c7_b2, c7_wf,
                  o_ref, *, nf):
    def combine(pa_ref, pb_ref, pc_ref, w1a, w1b, w1c, b1, w2, b2, wf):
        pa = pa_ref[...]
        pb = pb_ref[...]
        pc = pc_ref[...]
        # attention 1x1 conv over cat([f1,f2,f3]); the DCT conv is folded into
        # the 1x1 weights at the wrapper (f_i = patches_i @ Wk, all linear).
        a = (jnp.dot(pa, w1a[...], preferred_element_type=jnp.float32)
             + jnp.dot(pb, w1b[...], preferred_element_type=jnp.float32)
             + jnp.dot(pc, w1c[...], preferred_element_type=jnp.float32)
             + b1[...])
        a = jnp.maximum(a, 0.0)                                       # ReLU
        s = jnp.dot(a, w2[...], preferred_element_type=jnp.float32) + b2[...]
        s = s - jnp.max(s, axis=1, keepdims=True)                     # softmax(3)
        e = jnp.exp(s)
        att = e / jnp.sum(e, axis=1, keepdims=True)
        # final 1x1 conv (bias-free) distributed over the weighted sum, with the
        # DCT conv folded in: c = sum_i att_i * (patches_i @ (Wk @ Wf)).
        return (att[:, 0:1] * jnp.dot(pa, wf[...], preferred_element_type=jnp.float32)
                + att[:, 1:2] * jnp.dot(pb, wf[...], preferred_element_type=jnp.float32)
                + att[:, 2:3] * jnp.dot(pc, wf[...], preferred_element_type=jnp.float32))

    # ConvFeatBlock stand-in: conv3x3(1 -> nf) + SiLU      TODO(synk): real ConvFeatBlock
    xf = jnp.dot(xp_ref[...], wx_ref[...], preferred_element_type=jnp.float32) + bx_ref[...]
    xf = xf * jax.nn.sigmoid(xf)

    comb3 = combine(p3a_ref, p3b_ref, p3c_ref, c3_w1a, c3_w1b, c3_w1c, c3_b1, c3_w2, c3_b2, c3_wf)
    comb5 = combine(p5a_ref, p5b_ref, p5c_ref, c5_w1a, c5_w1b, c5_w1c, c5_b1, c5_w2, c5_b2, c5_wf)
    comb7 = combine(p7a_ref, p7b_ref, p7c_ref, c7_w1a, c7_w1b, c7_w1c, c7_b1, c7_w2, c7_b2, c7_wf)

    # single lane-dense (tm, nf + 192) store of the whole hs[0] slab
    o_ref[...] = jnp.concatenate([xf, comb3, comb5, comb7], axis=1)


def frequency_combiner_front(xp, pat3, pat5, pat7, params, nf, *, block_m=256):
    M = xp.shape[0]
    tm = min(block_m, M)
    out_c = nf + 3 * 64
    row = lambda i: (i, 0)
    const = lambda i: (0, 0)

    patch_in = [xp] + list(pat3) + list(pat5) + list(pat7)
    weight_in = [params["wx"], params["bx"]]
    for csz in (9, 25, 49):
        cc = params["comb"][csz]
        weight_in += [cc["w1a"], cc["w1b"], cc["w1c"], cc["b1"],
                      cc["w2"], cc["b2"], cc["wf"]]

    in_specs = ([pl.BlockSpec((tm, a.shape[1]), row) for a in patch_in]
                + [pl.BlockSpec(w.shape, const) for w in weight_in])

    return pl.pallas_call(
        functools.partial(_front_kernel, nf=nf),
        out_shape=jax.ShapeDtypeStruct((M, out_c), F32),
        grid=(pl.cdiv(M, tm),),
        in_specs=in_specs,
        out_specs=pl.BlockSpec((tm, out_c), row),
        compiler_params=pltpu.CompilerParams(dimension_semantics=("parallel",)),
    )(*patch_in, *weight_in)


def _im2col_1ch(x_nhwc, k):
    """im2col of a 1-channel NHWC image -> (B*H*W, k*k).  Kept in XLA: the input
    is single-channel so the expansion is tiny (no 256-channel blow-up)."""
    B, H, W, C = x_nhwc.shape
    assert C == 1
    p = (k - 1) // 2
    xp = jnp.pad(x_nhwc[..., 0], ((0, 0), (p, p), (p, p)))
    cols = [xp[:, i:i + H, j:j + W] for i in range(k) for j in range(k)]
    return jnp.stack(cols, axis=-1).reshape(B * H * W, k * k)


# ----------------------------------------------------------------------------
# Fused tail: GroupNorm + SiLU + conv3x3 + tanh  (two tiled Pallas passes)
# ----------------------------------------------------------------------------
def _gn_stats_kernel(x_ref, gmat_ref, o_ref):
    t = pl.program_id(1)

    @pl.when(t == 0)
    def _():
        o_ref[...] = jnp.zeros_like(o_ref)

    x = x_ref[0]                                                      # (th, W, C)
    s1 = jnp.sum(jnp.sum(x, axis=0), axis=0, keepdims=True)           # (1, C)
    s2 = jnp.sum(jnp.sum(x * x, axis=0), axis=0, keepdims=True)       # (1, C)
    g1 = jnp.dot(s1, gmat_ref[...], preferred_element_type=jnp.float32)   # (1, G)
    g2 = jnp.dot(s2, gmat_ref[...], preferred_element_type=jnp.float32)
    o_ref[0, 0:1, :] += g1
    o_ref[0, 1:2, :] += g2


def _gn_group_sums(h_bhwc, gmat, th):
    B, H, W, C = h_bhwc.shape
    G = gmat.shape[1]
    n_t = H // th
    return pl.pallas_call(
        _gn_stats_kernel,
        out_shape=jax.ShapeDtypeStruct((B, 2, G), F32),
        grid=(B, n_t),
        in_specs=[pl.BlockSpec((1, th, W, C), lambda b, t: (b, t, 0, 0)),
                  pl.BlockSpec((C, G), lambda b, t: (0, 0))],
        out_specs=pl.BlockSpec((1, 2, G), lambda b, t: (b, 0, 0)),
        compiler_params=pltpu.CompilerParams(
            dimension_semantics=("parallel", "arbitrary")),
    )(h_bhwc, gmat)


def _gn_conv_tail_kernel(hs_ref, mean_ref, rstd_ref, gamma_ref, beta_ref,
                         w_ref, b_ref, o_ref, xbuf, nbuf,
                         *, th, W, C, O, n_t, use_tanh):
    b = pl.program_id(0)
    t = pl.program_id(1)
    r0 = pl.multiple_of(t * th, th)

    # --- manual DMA of the row tile with a one-row halo (no im2col in HBM) ---
    pltpu.sync_copy(hs_ref.at[b, pl.ds(r0, th)], xbuf.at[pl.ds(1, th)])

    @pl.when(t > 0)
    def _():
        pltpu.sync_copy(hs_ref.at[b, pl.ds(r0 - 1, 1)], xbuf.at[pl.ds(0, 1)])

    @pl.when(t < n_t - 1)
    def _():
        pltpu.sync_copy(hs_ref.at[b, pl.ds(r0 + th, 1)], xbuf.at[pl.ds(th + 1, 1)])

    mean = mean_ref[0]      # (1, C)  per-(batch, channel) GroupNorm mean
    rstd = rstd_ref[0]      # (1, C)
    gamma = gamma_ref[0]    # (1, C)
    beta = beta_ref[0]      # (1, C)

    lo = jnp.where(t == 0, 1, 0)                 # image-boundary rows -> zero padding
    hi = jnp.where(t == n_t - 1, th + 1, th + 2)

    zrow = jnp.zeros((1, C), jnp.float32)
    for r in range(th + 2):                      # GroupNorm + affine + SiLU, row by row
        xr = xbuf[r]                             # (W, C)
        yr = (xr - mean) * rstd * gamma + beta
        yr = yr * jax.nn.sigmoid(yr)             # SiLU
        valid = jnp.logical_and(r >= lo, r < hi)
        yr = jnp.where(valid, yr, 0.0)           # conv zero padding is applied post-act
        nbuf[r, 1:W + 1, :] = yr
        nbuf[r, 0:1, :] = zrow                   # zero left/right padding columns
        nbuf[r, W + 1:W + 2, :] = zrow

    taps = [w_ref[k] for k in range(9)]          # 9 x (C, O) conv taps (bf16)
    bias = b_ref[...]                            # (1, O)
    for i in range(th):                          # 3x3 conv = 9 shifted matmuls / row
        acc = jnp.zeros((W, O), jnp.float32) + bias
        for dy in range(3):
            row_sl = nbuf[i + dy]                # (W + 2, C)
            for dx in range(3):
                sl = row_sl[dx:dx + W, :].astype(taps[0].dtype)
                acc = acc + jnp.dot(sl, taps[dy * 3 + dx],
                                    preferred_element_type=jnp.float32)
        res = jnp.tanh(acc) if use_tanh else acc
        o_ref[0, i] = res


def gn_silu_conv3x3_tanh(h_bhwc, gamma, beta, w_oihw, bias, *, num_groups,
                         eps=1e-6, use_tanh=True, row_tile=8):
    """Fused GroupNorm -> SiLU -> SAME 3x3 conv -> (tanh), channels-last."""
    B, H, W, C = h_bhwc.shape
    O = w_oihw.shape[0]
    th = row_tile if H % row_tile == 0 else H
    n_t = H // th
    G = num_groups
    cg = C // G

    h_bhwc = h_bhwc.astype(F32)
    gmat = jnp.asarray(np.eye(G, dtype=np.float32)[np.arange(C) // cg])   # (C, G)

    # pass 1: per-(batch, group) sums accumulated over row tiles
    sums = _gn_group_sums(h_bhwc, gmat, th)                               # (B, 2, G)
    cnt = float(H * W * cg)
    mean_g = sums[:, 0, :] / cnt
    var_g = jnp.maximum(sums[:, 1, :] / cnt - mean_g * mean_g, 0.0)       # clamp vs cancellation
    rstd_g = jax.lax.rsqrt(var_g + eps)
    mean_c = jnp.repeat(mean_g, cg, axis=1).reshape(B, 1, C)
    rstd_c = jnp.repeat(rstd_g, cg, axis=1).reshape(B, 1, C)

    w_taps = jnp.transpose(w_oihw, (2, 3, 1, 0)).reshape(9, C, O).astype(BF16)
    b2d = bias.reshape(1, O).astype(F32)
    gamma3 = gamma.reshape(1, 1, C).astype(F32)
    beta3 = beta.reshape(1, 1, C).astype(F32)

    kern = functools.partial(_gn_conv_tail_kernel, th=th, W=W, C=C, O=O,
                             n_t=n_t, use_tanh=use_tanh)
    return pl.pallas_call(
        kern,
        out_shape=jax.ShapeDtypeStruct((B, H, W, O), F32),
        grid=(B, n_t),
        in_specs=[
            pl.BlockSpec(memory_space=pl.ANY),                 # activations stay in HBM
            pl.BlockSpec((1, 1, C), lambda b, t: (b, 0, 0)),   # mean per channel
            pl.BlockSpec((1, 1, C), lambda b, t: (b, 0, 0)),   # rstd per channel
            pl.BlockSpec((1, 1, C), lambda b, t: (0, 0, 0)),   # gamma
            pl.BlockSpec((1, 1, C), lambda b, t: (0, 0, 0)),   # beta
            pl.BlockSpec((9, C, O), lambda b, t: (0, 0, 0)),   # conv taps
            pl.BlockSpec((1, O), lambda b, t: (0, 0)),         # conv bias
        ],
        out_specs=pl.BlockSpec((1, th, W, O), lambda b, t: (b, t, 0, 0)),
        scratch_shapes=[pltpu.VMEM((th + 2, W, C), F32),       # raw rows + halo
                        pltpu.VMEM((th + 2, W + 2, C), F32)],  # normalized + W padding
        compiler_params=pltpu.CompilerParams(
            dimension_semantics=("parallel", "arbitrary")),
    )(h_bhwc, mean_c, rstd_c, gamma3, beta3, w_taps, b2d)


# ----------------------------------------------------------------------------
# Model
# ----------------------------------------------------------------------------
class NCSNppFreqPallas:
    def __init__(self, key, *, nf=64, num_channels=1, z_emb_dim=32, nz=16,
                 n_mlp=2, centered=False, not_use_tanh=False):
        # nf must be 64 so that cat(x_feat, 3x 64-ch combiner feats) == 4*nf,
        # matching the original module's hard-coded AdaptiveCombiner(…, 64).
        assert nf == 64
        self.nf = nf
        self.num_channels = num_channels
        self.z_emb_dim = z_emb_dim
        self.nz = nz
        self.n_mlp = n_mlp
        self.centered = centered
        self.not_use_tanh = not_use_tanh

        self.k3 = jnp.asarray(initDCTKernel(3), F32)   # (9, 1, 3, 3)
        self.k5 = jnp.asarray(initDCTKernel(5), F32)   # (25, 1, 5, 5)
        self.k7 = jnp.asarray(initDCTKernel(7), F32)   # (49, 1, 7, 7)

        keys = iter(jax.random.split(key, 64))
        nrm = lambda k, shp, s=0.02: s * jax.random.normal(k, shp, dtype=F32)
        p = {}

        # z_transform: PixelNorm -> dense(nz, zdim) -> SiLU -> n_mlp x [dense -> SiLU]
        p["z_w"] = [nrm(next(keys), (nz, z_emb_dim))] + \
                   [nrm(next(keys), (z_emb_dim, z_emb_dim)) for _ in range(n_mlp)]
        p["z_b"] = [jnp.zeros((z_emb_dim,), F32) for _ in range(n_mlp + 1)]

        # conditional temb MLP: Linear(nf, 4nf) then Linear(4nf, 4nf), zero biases
        p["t_w0"] = nrm(next(keys), (nf, 4 * nf)); p["t_b0"] = jnp.zeros((4 * nf,), F32)
        p["t_w1"] = nrm(next(keys), (4 * nf, 4 * nf)); p["t_b1"] = jnp.zeros((4 * nf,), F32)

        # TODO(synk): layerspp.ConvFeatBlock source unavailable; deterministic
        # conv3x3(1 -> nf) + SiLU stand-in producing the nf-channel x_feat.
        xconv = nrm(next(keys), (nf, 1, 3, 3))
        p["wx"] = jnp.transpose(xconv, (2, 3, 1, 0)).reshape(9, nf).astype(BF16)
        p["bx"] = jnp.zeros((1, nf), F32)

        # AdaptiveCombiner parameters for C in {9, 25, 49}; the DCT analysis conv
        # is folded into the 1x1 convs (exact: everything is linear).
        p["comb"] = {}
        for ksz, dct in ((3, self.k3), (5, self.k5), (7, self.k7)):
            C = ksz * ksz
            wk_cl = jnp.transpose(dct, (2, 3, 1, 0)).reshape(C, C)   # channels-last DCT weight
            w1_cl = nrm(next(keys), (3 * C, C))      # Conv2d(3C -> C, 1x1), channels-last
            w2_cl = nrm(next(keys), (C, 3))          # Conv2d(C -> 3, 1x1), channels-last
            wf_cl = nrm(next(keys), (C, 64))         # Conv2d(C -> 64, 1x1, bias=False)
            p["comb"][C] = dict(
                w1a=jnp.dot(wk_cl, w1_cl[0:C]).astype(BF16),
                w1b=jnp.dot(wk_cl, w1_cl[C:2 * C]).astype(BF16),
                w1c=jnp.dot(wk_cl, w1_cl[2 * C:3 * C]).astype(BF16),
                b1=jnp.zeros((1, C), F32),
                w2=w2_cl,
                b2=jnp.zeros((1, 3), F32),
                wf=jnp.dot(wk_cl, wf_cl).astype(BF16),
            )

        # Output tail: GroupNorm(min(ch//4, 32), eps=1e-6) + conv3x3(ch -> num_channels)
        c_tail = 4 * nf
        p["gn_gamma"] = jnp.ones((c_tail,), F32)
        p["gn_beta"] = jnp.zeros((c_tail,), F32)
        p["out_w"] = nrm(next(keys), (num_channels, c_tail, 3, 3))
        p["out_b"] = jnp.zeros((num_channels,), F32)
        self.params = p

    # ---- forward -------------------------------------------------------------
    def forward(self, x, cond1, cond2, cond3, time_cond, z):
        prm = self.params
        B, Cin, H, W = x.shape
        assert Cin == 1  # DCT analysis kernels are single-channel (as in the reference)

        # conditioning (single fused kernel each; they feed the layerspp trunk)
        zemb = z_transform_pallas(z, prm["z_w"], prm["z_b"])
        temb = get_timestep_embedding(time_cond, self.nf)
        temb = temb_mlp_pallas(temb, prm["t_w0"], prm["t_b0"], prm["t_w1"], prm["t_b1"])
        # TODO(synk): temb/zemb condition the layerspp ResnetBlock trunk (source
        # not provided); they are computed faithfully but unused below.
        del zemb, temb

        if not self.centered:
            x = 2.0 * x - 1.0

        # NCHW -> NHWC once; everything downstream is channels-last.
        to_nhwc = lambda a: jnp.transpose(a, (0, 2, 3, 1))
        x_nhwc = to_nhwc(x)
        conds = [to_nhwc(c) for c in (cond1, cond2, cond3)]

        # 1-channel im2col patches (k*k columns, tiny) in bf16 for the MXU
        xp = _im2col_1ch(x_nhwc, 3).astype(BF16)
        pat3 = [_im2col_1ch(c, 3).astype(BF16) for c in conds]
        pat5 = [_im2col_1ch(c, 5).astype(BF16) for c in conds]
        pat7 = [_im2col_1ch(c, 7).astype(BF16) for c in conds]

        # fused DCT + AdaptiveCombiners + x-feature conv -> lane-dense hs[0] slab
        hs0 = frequency_combiner_front(xp, pat3, pat5, pat7, prm, self.nf)
        hs0 = hs0.reshape(B, H, W, 4 * self.nf)

        # TODO(synk): NCSN++ encoder/decoder trunk (layerspp ResnetBlockBigGANpp_Adagn,
        # AttnBlockpp, FIR Up/Downsample, Combine) omitted -- source not provided.
        h = hs0

        # fused GroupNorm -> SiLU -> conv3x3 -> tanh tail (progressive='none')
        c_tail = 4 * self.nf
        out_nhwc = gn_silu_conv3x3_tanh(
            h, prm["gn_gamma"], prm["gn_beta"], prm["out_w"], prm["out_b"],
            num_groups=min(c_tail // 4, 32), eps=1e-6,
            use_tanh=not self.not_use_tanh)

        return jnp.transpose(out_nhwc, (0, 3, 1, 2))   # back to NCHW at the boundary


# ----------------------------------------------------------------------------
# Demo
# ----------------------------------------------------------------------------
if __name__ == "__main__":
    key = jax.random.PRNGKey(0)
    k_par, k_x, k_c1, k_c2, k_c3, k_t, k_z = jax.random.split(key, 7)

    B, C_in, H, W = 2, 1, 16, 16
    nz = 16

    model = NCSNppFreqPallas(k_par, nf=64, num_channels=C_in, z_emb_dim=32,
                             nz=nz, n_mlp=2, centered=False, not_use_tanh=False)

    x = jax.random.uniform(k_x, (B, C_in, H, W), dtype=F32)
    cond1 = jax.random.normal(k_c1, (B, C_in, H, W), dtype=F32)
    cond2 = jax.random.normal(k_c2, (B, C_in, H, W), dtype=F32)
    cond3 = jax.random.normal(k_c3, (B, C_in, H, W), dtype=F32)
    time_cond = jax.random.uniform(k_t, (B,), dtype=F32) * 999.0
    z = jax.random.normal(k_z, (B, nz), dtype=F32)

    out = model.forward(x, cond1, cond2, cond3, time_cond, z)
    out = jax.block_until_ready(out)

    assert out.shape == (B, C_in, H, W), out.shape
    assert bool(jnp.all(jnp.isfinite(out)))
    print("KERNEL_OK")
</pallas_src>

<mosaic_0001>
module attributes {stable_mosaic.version = 11 : i64} {
  func.func @_zmlp_kernel(%arg0: memref<2x16xf32, #tpu.memory_space<vmem>>, %arg1: memref<16x32xf32, #tpu.memory_space<vmem>>, %arg2: memref<1x32xf32, #tpu.memory_space<vmem>>, %arg3: memref<32x32xf32, #tpu.memory_space<vmem>>, %arg4: memref<1x32xf32, #tpu.memory_space<vmem>>, %arg5: memref<32x32xf32, #tpu.memory_space<vmem>>, %arg6: memref<1x32xf32, #tpu.memory_space<vmem>>, %arg7: memref<2x32xf32, #tpu.memory_space<vmem>>) attributes {dimension_semantics = [], scalar_prefetch = 0 : i64, scratch_operands = 0 : i64, tpu.core_type = #tpu.core_type<tc>} {
    %c0 = arith.constant 0 : index
    %c0_0 = arith.constant 0 : index
    %0 = vector.load %arg0[%c0, %c0_0] : memref<2x16xf32, #tpu.memory_space<vmem>>, vector<2x16xf32>
    %1 = arith.mulf %0, %0 : vector<2x16xf32>
    %cst = arith.constant dense<0.000000e+00> : vector<2xf32>
    %2 = vector.multi_reduction <add>, %1, %cst [1] : vector<2x16xf32> to vector<2xf32>
    %3 = vector.shape_cast %2 : vector<2xf32> to vector<2x1xf32>
    %cst_1 = arith.constant 1.600000e+01 : f32
    %4 = vector.broadcast %cst_1 : f32 to vector<2x1xf32>
    %5 = arith.divf %3, %4 : vector<2x1xf32>
    %cst_2 = arith.constant 9.99999993E-9 : f32
    %6 = vector.broadcast %cst_2 : f32 to vector<2x1xf32>
    %7 = arith.addf %5, %6 : vector<2x1xf32>
    %8 = math.rsqrt %7 : vector<2x1xf32>
    %9 = vector.broadcast %8 : vector<2x1xf32> to vector<2x16xf32>
    %10 = arith.mulf %0, %9 : vector<2x16xf32>
    %c0_3 = arith.constant 0 : index
    %c0_4 = arith.constant 0 : index
    %11 = vector.load %arg1[%c0_3, %c0_4] : memref<16x32xf32, #tpu.memory_space<vmem>>, vector<16x32xf32>
    %cst_5 = arith.constant dense<0.000000e+00> : vector<2x32xf32>
    %12 = tpu.matmul %10, %11, %cst_5 {dimension_numbers = #tpu.dot_dimension_numbers<[1], [0], [0], [1], [0, 0, 1, 1], [], []>} : vector<2x16xf32>, vector<16x32xf32>, vector<2x32xf32> -> vector<2x32xf32>
    %c0_6 = arith.constant 0 : index
    %c0_7 = arith.constant 0 : index
    %13 = vector.load %arg2[%c0_6, %c0_7] : memref<1x32xf32, #tpu.memory_space<vmem>>, vector<1x32xf32>
    %14 = vector.broadcast %13 : vector<1x32xf32> to vector<2x32xf32>
    %15 = arith.addf %12, %14 : vector<2x32xf32>
    %16 = arith.negf %15 : vector<2x32xf32>
    %17 = math.exp %16 : vector<2x32xf32>
    %cst_8 = arith.constant 1.000000e+00 : f32
    %18 = vector.broadcast %cst_8 : f32 to vector<2x32xf32>
    %19 = arith.addf %18, %17 : vector<2x32xf32>
    %20 = arith.divf %18, %19 : vector<2x32xf32>
    %21 = arith.mulf %15, %20 : vector<2x32xf32>
    %c0_9 = arith.constant 0 : index
    %c0_10 = arith.constant 0 : index
    %22 = vector.load %arg3[%c0_9, %c0_10] : memref<32x32xf32, #tpu.memory_space<vmem>>, vector<32x32xf32>
    %cst_11 = arith.constant dense<0.000000e+00> : vector<2x32xf32>
    %23 = tpu.matmul %21, %22, %cst_11 {dimension_numbers = #tpu.dot_dimension_numbers<[1], [0], [0], [1], [0, 0, 1, 1], [], []>} : vector<2x32xf32>, vector<32x32xf32>, vector<2x32xf32> -> vector<2x32xf32>
    %c0_12 = arith.constant 0 : index
    %c0_13 = arith.constant 0 : index
    %24 = vector.load %arg4[%c0_12, %c0_13] : memref<1x32xf32, #tpu.memory_space<vmem>>, vector<1x32xf32>
    %25 = vector.broadcast %24 : vector<1x32xf32> to vector<2x32xf32>
    %26 = arith.addf %23, %25 : vector<2x32xf32>
    %27 = arith.negf %26 : vector<2x32xf32>
    %28 = math.exp %27 : vector<2x32xf32>
    %cst_14 = arith.constant 1.000000e+00 : f32
    %29 = vector.broadcast %cst_14 : f32 to vector<2x32xf32>
    %30 = arith.addf %29, %28 : vector<2x32xf32>
    %31 = arith.divf %29, %30 : vector<2x32xf32>
    %32 = arith.mulf %26, %31 : vector<2x32xf32>
    %c0_15 = arith.constant 0 : index
    %c0_16 = arith.constant 0 : index
    %33 = vector.load %arg5[%c0_15, %c0_16] : memref<32x32xf32, #tpu.memory_space<vmem>>, vector<32x32xf32>
    %cst_17 = arith.constant dense<0.000000e+00> : vector<2x32xf32>
    %34 = tpu.matmul %32, %33, %cst_17 {dimension_numbers = #tpu.dot_dimension_numbers<[1], [0], [0], [1], [0, 0, 1, 1], [], []>} : vector<2x32xf32>, vector<32x32xf32>, vector<2x32xf32> -> vector<2x32xf32>
    %c0_18 = arith.constant 0 : index
    %c0_19 = arith.constant 0 : index
    %35 = vector.load %arg6[%c0_18, %c0_19] : memref<1x32xf32, #tpu.memory_space<vmem>>, vector<1x32xf32>
    %36 = vector.broadcast %35 : vector<1x32xf32> to vector<2x32xf32>
    %37 = arith.addf %34, %36 : vector<2x32xf32>
    %38 = arith.negf %37 : vector<2x32xf32>
    %39 = math.exp %38 : vector<2x32xf32>
    %cst_20 = arith.constant 1.000000e+00 : f32
    %40 = vector.broadcast %cst_20 : f32 to vector<2x32xf32>
    %41 = arith.addf %40, %39 : vector<2x32xf32>
    %42 = arith.divf %40, %41 : vector<2x32xf32>
    %43 = arith.mulf %37, %42 : vector<2x32xf32>
    %c0_21 = arith.constant 0 : index
    %c0_22 = arith.constant 0 : index
    %44 = vector.load %arg7[%c0_21, %c0_22] : memref<2x32xf32, #tpu.memory_space<vmem>>, vector<2x32xf32>
    tpu.vector_store %arg7[%c0_21, %c0_22], %43 {strides = array<i32>} : memref<2x32xf32, #tpu.memory_space<vmem>>, vector<2x32xf32>,
    return
  }
}

</mosaic_0001>

<bundles_post_ra>
// kernel: tpu_custom_call.1
= control target key start
LH: loop header
LB: loop body
LE: loop exit
PB: predicated region body
PF: predicated region fallthrough
CT: control target
= control target key end

     0   :  { %12 = vsyncpa [#allocation3], 0  ;;  %s721_s0 = inlined_call_operand.hbm [shape: f32[2,16], index: 0, kind: input, shape index: {}]   ;;  %s722_s1 = inlined_call_operand.hbm [shape: f32[16,32], index: 1, kind: input, shape index: {}]   ;;  %s723_s2 = inlined_call_operand.vmem [shape: f32[1,32], index: 2, kind: input, shape index: {}]   ;;  %s724_s3 = inlined_call_operand.hbm [shape: f32[32,32], index: 3, kind: input, shape index: {}]   ;;  %s725_s4 = inlined_call_operand.vmem [shape: f32[1,32], index: 4, kind: input, shape index: {}]   ;;  %s726_s5 = inlined_call_operand.hbm [shape: f32[32,32], index: 5, kind: input, shape index: {}]   ;;  %s727_s6 = inlined_call_operand.vmem [shape: f32[1,32], index: 6, kind: input, shape index: {}]   ;;  %s728_s7 = inlined_call_operand.hbm [shape: f32[2,32], index: 7, kind: output, shape index: {}]  }
   0x1   :  { %13 = vsyncpa [#allocation6], 0 }
   0x2   :  { %14 = vsyncpa [#allocation9], 0 }
   0x3   :  { %15 = vsyncpa [#allocation4], 0  ;;  %s591_s24 = smov [#allocation5]   ;;  %s473_s28 = scalar_lea.hbm %s722_s1, 256 }
   0x4   :  { %s31_s25 = sshll.u32 %s591_s24, 4  ;;  %p474_p0 = scmp.ne.s32.totalorder %s722_s1, %s473_s28  ;;  %s32_s25 = int_to_ptr.vmem [resolvable:$true] %s31_s25 }
   0x5   :  { %p477_p1 = scmp.lt.u32.totalorder %s473_s28, %s722_s1 }
   0x7   :  { %p479_p2 = pnand %p477_p1, %p474_p0 }
   0x9   :  { %482 = shalt.err (!%p479_p2)
}
   0xa   :  { %s483_s10 = scalar_lea.vmem %s32_s25, 256  ;;  %p488_p4 = scmp.lt.s32.totalorder %s32_s25, %s32_s25 }
   0xb   :  { %p484_p3 = scmp.ne.s32.totalorder %s32_s25, %s483_s10  ;;  %p489_p5 = scmp.lt.s32.totalorder %s483_s10, %s483_s10 }
   0xd   :  { %p490_p6 = por %p489_p5, %p488_p4 }
   0xf   :  { %p491_p7 = pnand %p490_p6, %p484_p3 }
  0x11   :  { %494 = shalt.err (!%p491_p7)
}
  0x12   :  { %s592_s11 = smov 128   ;;  %s593_s12 = smov 8  }
  0x13   :  { %37 = dma.hbm_to_vmem [thread:$0]  %s722_s1, 256, %s32_s25, [#allocation6], %s592_s11, %s592_s11, %s593_s12  }
  0x14   :  { %s594_s15 = smov [#allocation2]   ;;  %s595_s17 = smov [#allocation7]  }
  0x15   :  { %s22_s16 = sshll.u32 %s594_s15, 4  ;;  %s45_s18 = sshll.u32 %s595_s17, 4  ;;  %s23_s16 = int_to_ptr.vmem [resolvable:$true] %s22_s16  ;;  %s46_s18 = int_to_ptr.vmem [resolvable:$true] %s45_s18 }
  0x16   :  { %s495_s21 = scalar_lea.hbm %s721_s0, 32 }
  0x17   :  { %p496_p8 = scmp.ne.s32.totalorder %s721_s0, %s495_s21  ;;  %p499_p9 = scmp.lt.u32.totalorder %s495_s21, %s721_s0 }
  0x19   :  { %p501_p10 = pnand %p499_p9, %p496_p8 }
  0x1b   :  { %504 = shalt.err (!%p501_p10)
}
  0x1c   :  { %s505_s1 = scalar_lea.vmem %s23_s16, 32  ;;  %p510_p12 = scmp.lt.s32.totalorder %s23_s16, %s23_s16 }
  0x1d   :  { %p506_p11 = scmp.ne.s32.totalorder %s23_s16, %s505_s1  ;;  %p511_p13 = scmp.lt.s32.totalorder %s505_s1, %s505_s1 }
  0x1f   :  { %p512_p0 = por %p511_p13, %p510_p12 }
  0x21   :  { %p513_p1 = pnand %p512_p0, %p506_p11 }
  0x23   :  { %516 = shalt.err (!%p513_p1)
}
  0x24   :  { %25 = dma.hbm_to_vmem [thread:$0]  %s721_s0, 32, %s23_s16, [#allocation3]  }
  0x25   :  { %s517_s30 = scalar_lea.hbm %s724_s3, 512 }
  0x26   :  { %p518_p2 = scmp.ne.s32.totalorder %s724_s3, %s517_s30  ;;  %p521_p3 = scmp.lt.u32.totalorder %s517_s30, %s724_s3 }
  0x28   :  { %p523_p4 = pnand %p521_p3, %p518_p2 }
  0x2a   :  { %526 = shalt.err (!%p523_p4)
}
  0x2b   :  { %s527_s14 = scalar_lea.vmem %s46_s18, 512  ;;  %p532_p6 = scmp.lt.s32.totalorder %s46_s18, %s46_s18 }
  0x2c   :  { %p528_p5 = scmp.ne.s32.totalorder %s46_s18, %s527_s14  ;;  %p533_p7 = scmp.lt.s32.totalorder %s527_s14, %s527_s14 }
  0x2e   :  { %p534_p8 = por %p533_p7, %p532_p6 }
  0x30   :  { %p535_p9 = pnand %p534_p8, %p528_p5 }
  0x32   :  { %538 = shalt.err (!%p535_p9)
}
  0x33   :  { %51 = dma.hbm_to_vmem [thread:$0]  %s724_s3, 512, %s46_s18, [#allocation6], %s592_s11, %s592_s11, %s593_s12  }
  0x34   :  { %s596_s16 = smov [#allocation8]   ;;  %s539_s21 = scalar_lea.hbm %s726_s5, 512 }
  0x35   :  { %s59_s17 = sshll.u32 %s596_s16, 4  ;;  %p540_p10 = scmp.ne.s32.totalorder %s726_s5, %s539_s21  ;;  %s60_s17 = int_to_ptr.vmem [resolvable:$true] %s59_s17 }
  0x36   :  { %p543_p11 = scmp.lt.u32.totalorder %s539_s21, %s726_s5 }
  0x38   :  { %p545_p12 = pnand %p543_p11, %p540_p10 }
  0x3a   :  { %548 = shalt.err (!%p545_p12)
}
  0x3b   :  { %s549_s1 = scalar_lea.vmem %s60_s17, 512  ;;  %p554_p0 = scmp.lt.s32.totalorder %s60_s17, %s60_s17 }
  0x3c   :  { %p550_p13 = scmp.ne.s32.totalorder %s60_s17, %s549_s1  ;;  %p555_p1 = scmp.lt.s32.totalorder %s549_s1, %s549_s1 }
  0x3e   :  { %p556_p2 = por %p555_p1, %p554_p0 }
  0x40   :  { %p557_p3 = pnand %p556_p2, %p550_p13 }
  0x42   :  { %560 = shalt.err (!%p557_p3)
}
  0x43   :  { %65 = dma.hbm_to_vmem [thread:$0]  %s726_s5, 512, %s60_s17, [#allocation9], %s592_s11, %s592_s11, %s593_s12  }
  0x44   :  { %583 = dma.done.wait [#allocation3], 32  }
  0x45   :  { %584 = vsyncadd [#allocation3], 4294967264 }
  0x46   :  { %585 = dma.done.wait [#allocation6], 768  }
  0x47   :  { %586 = vsyncadd [#allocation6], 4294966528 }
  0x48   :  { %587 = dma.done.wait [#allocation9], 512  }
  0x49   :  { %588 = vsyncadd [#allocation9], 4294966784  ;;  %v80_v0 = vld [vmem:[#allocation2] sm:$0x3]  ;;  %vm82_vm0 = vcmask 123904   ;;  %v91_v3 = vld [vmem:[#allocation5] sm:$0xff] }
  0x4a   :  { %v81_v1 = vmul.f32 %v80_v0, %v80_v0  ;;  %v92_v4 = vld [vmem:[#allocation5 + $0x8] sm:$0xff]  ;;  %v597_v5 = vmov 0.0|0.0   ;;  %vm598_vm1 = vmmov 0   ;;  %v599_v7 = vmov 0.0   ;;  %v181_v13 = vld [vmem:[#allocation7] sm:$0xff]  ;;  %v182_v14 = vld [vmem:[#allocation7 + $0x8] sm:$0xff] }
  0x4b   :  { %434 = vmatprep.subr.bf16.mxu0 %v597_v5  ;;  %v435_v6 = vpack.c.bf16 %v92_v4, %v91_v3  ;;  %409 = vmatprep.mubr.msk.f32.mxu0 %vm598_vm1, %v599_v7  ;;  %vm100_vm2 = vcmask 130048   ;;  %v438_v15 = vpack.c.bf16 %v182_v14, %v181_v13  ;;  %v183_v16 = vld [vmem:[#allocation7 + $0x10] sm:$0xff]  ;;  %v184_v17 = vld [vmem:[#allocation7 + $0x18] sm:$0xff]  ;;  %v383_v19 = vld [vmem:[%s723_s2] ss:$0 sm:$0xff]  ;;  %vm192_vm3 = vcmask 261120  }
  0x4c   :  { %v83_v2 = vsel %vm82_vm0, %v81_v1, 0.0  ;;  %437 = vmatprep.subr.bf16.mxu1 %v597_v5  ;;  %420 = vmatprep.mubr.msk.f32.mxu1 %vm598_vm1, %v599_v7  ;;  %v441_v18 = vpack.c.bf16 %v184_v17, %v183_v16  ;;  %v273_v28 = vld [vmem:[#allocation8] sm:$0xff]  ;;  %v274_v29 = vld [vmem:[#allocation8 + $0x8] sm:$0xff]  ;;  %v275_v31 = vld [vmem:[#allocation8 + $0x10] sm:$0xff]  ;;  %vm364_vm4 = vcmask 254976  }
  0x4d   :  { %84 = vadd.xlane.f32.xlu0 %v83_v2  ;;  %436 = vmatpush3.bf16.msra.mxu0 %v435_v6  ;;  %v444_v30 = vpack.c.bf16 %v274_v29, %v273_v28  ;;  %v276_v32 = vld [vmem:[#allocation8 + $0x18] sm:$0xff]  ;;  %v386_v34 = vld [vmem:[%s725_s4] ss:$0 sm:$0xff]  ;;  %s600_s4 = smov [#allocation10]  }
  0x4e   :  { %443 = vmatprep.subr.bf16.mxu0 %v597_v5  ;;  %439 = vmatpush3.bf16.msra.mxu1 %v438_v15  ;;  %v447_v33 = vpack.c.bf16 %v276_v32, %v275_v31  ;;  %v389_v43 = vld [vmem:[%s727_s6] ss:$0 sm:$0xff]  ;;  %s372_s28 = sshll.u32 %s600_s4, 4  ;;  %s373_s28 = int_to_ptr.vmem [resolvable:$true] %s372_s28 }
  0x4f   :  { %440 = vmatprep.subr.bf16.mxu1 %v597_v5  ;;  %s561_s29 = scalar_lea.vmem %s373_s28, 32  ;;  %p566_p5 = scmp.lt.s32.totalorder %s373_s28, %s373_s28 }
  0x50   :  { %p562_p4 = scmp.ne.s32.totalorder %s373_s28, %s561_s29  ;;  %p567_p6 = scmp.lt.s32.totalorder %s561_s29, %s561_s29 }
  0x52   :  { %442 = vmatpush3.bf16.msra.mxu1 %v441_v18  ;;  %p568_p7 = por %p567_p6, %p566_p5 }
  0x54   :  { %p569_p8 = pnand %p568_p7, %p562_p4 }
  0xda   :  { %v85_v8 = vpop.xlane.xlu0 %84 }
  0xdb   :  { %v87_v9 = vmul.f32 0.0625, %v85_v8 }
  0xdd   :  { %v88_v10 = vadd.f32 1e-08, %v87_v9 }
  0xdf   :  { %459 = vrsqrt.f32 %v88_v10 }
  0xe9   :  { %v460_v11 = vpop.eup %459 }
  0xea   :  { %v90_v12 = vmul.f32 %v460_v11, %v80_v0 }
  0xec   :  { %410 = vmatmul.mubr.msk.f32.vlgmr.msra.gmra.mrb[0].mxu0 %vm100_vm2, %v90_v12 }
  0xed   :  { %431 = vmatprep.mubr.msk.f32.mxu0 %vm598_vm1, %v599_v7  ;;  %445 = vmatpush3.bf16.msra.mxu0 %v444_v30 }
  0xee   :  { %446 = vmatprep.subr.bf16.mxu0 %v597_v5 }
  0xf1   :  { %448 = vmatpush3.bf16.msra.mxu0 %v447_v33 }
 0x1bf   :  { %v170_v20 = vpop.f32.mrb[0].mxu0 }
 0x1c0   :  { %v171_v21 = vadd.f32 %v383_v19, %v170_v20  ;;  %v411_v22 = vpop.f32.mrb[1].mxu0 }
 0x1c2   :  { %v385_v23 = vmul.f32 -1.442695, %v171_v21 }
 0x1c4   :  { %461 = vpow2.f32 %v385_v23 }
 0x1ce   :  { %v462_v24 = vpop.eup %461 }
 0x1cf   :  { %v177_v25 = vadd.f32 1.0, %v462_v24 }
 0x1d1   :  { %463 = vrcp.f32 %v177_v25 }
 0x1db   :  { %v464_v26 = vpop.eup %463 }
 0x1dc   :  { %v180_v27 = vmul.f32 %v464_v26, %v171_v21 }
 0x1de   :  { %421 = vmatmul.mubr.msk.f32.vlgmr.msra.gmra.mrb[0].mxu1 %vm192_vm3, %v180_v27 }
 0x2b1   :  { %v262_v35 = vpop.f32.mrb[0].mxu1 }
 0x2b2   :  { %v263_v36 = vadd.f32 %v386_v34, %v262_v35  ;;  %v422_v37 = vpop.f32.mrb[1].mxu1 }
 0x2b4   :  { %v388_v38 = vmul.f32 -1.442695, %v263_v36 }
 0x2b6   :  { %465 = vpow2.f32 %v388_v38 }
 0x2c0   :  { %v466_v39 = vpop.eup %465 }
 0x2c1   :  { %v269_v40 = vadd.f32 1.0, %v466_v39 }
 0x2c3   :  { %467 = vrcp.f32 %v269_v40 }
 0x2cd   :  { %v468_v41 = vpop.eup %467 }
 0x2ce   :  { %v272_v42 = vmul.f32 %v468_v41, %v263_v36 }
 0x2d0   :  { %432 = vmatmul.mubr.msk.f32.vlgmr.msra.gmra.mrb[2].mxu0 %vm192_vm3, %v272_v42 }
 0x3a3   :  { %v353_v44 = vpop.f32.mrb[2].mxu0 }
 0x3a4   :  { %v354_v45 = vadd.f32 %v389_v43, %v353_v44  ;;  %v433_v46 = vpop.f32.mrb[3].mxu0 }
 0x3a6   :  { %v391_v47 = vmul.f32 -1.442695, %v354_v45 }
 0x3a8   :  { %469 = vpow2.f32 %v391_v47 }
 0x3b2   :  { %v470_v48 = vpop.eup %469 }
 0x3b3   :  { %v360_v49 = vadd.f32 1.0, %v470_v48 }
 0x3b5   :  { %471 = vrcp.f32 %v360_v49 }
 0x3bf   :  { %v472_v50 = vpop.eup %471 }
 0x3c0   :  { %v363_v51 = vmul.f32 %v472_v50, %v354_v45 }
 0x3c2   :  { %365 = vst.msk [vmem:[#allocation10] sm:$0x3] %vm364_vm4, %v363_v51 }
 0x3c3   :  { %572 = shalt.err (!%p569_p8)
}
 0x3c4   :  { %s573_s8 = scalar_lea.hbm %s728_s7, 32 }
 0x3c5   :  { %p574_p9 = scmp.ne.s32.totalorder %s728_s7, %s573_s8  ;;  %p577_p10 = scmp.lt.u32.totalorder %s573_s8, %s728_s7 }
 0x3c7   :  { %p579_p11 = pnand %p577_p10, %p574_p9 }
 0x3c9   :  { %582 = shalt.err (!%p579_p11)
}
 0x3ca   :  { %375 = dma.vmem_to_hbm [thread:$0]  %s373_s28, 32, %s728_s7, [#allocation4]  }
 0x3cb   :  { %589 = dma.done.wait [#allocation4], 32  }
 0x3cc   :  { %590 = vsyncadd [#allocation4], 4294967264 }
 0x3cd   :  { %379 = vsyncpa [#allocation3], 1 }
 0x3ce   :  { %380 = vsyncpa [#allocation6], 1 }
 0x3cf   :  { %381 = vsyncpa [#allocation9], 1 }
 0x3d0   :  { %382 = vsyncpa [#allocation4], 1 }

</bundles_post_ra>
